<compile_context>
chip_gen: v7x
topology: tpu7x:2x2x1
jax: 0.10.0
libtpu: 0.0.40
codegen_flags: <defaults>
</compile_context>

<pallas_src>
import functools

import jax
import jax.numpy as jnp
from jax import lax
from jax.experimental import pallas as pl
from jax.experimental.pallas import tpu as pltpu


def _round_up(x, m):
    return ((x + m - 1) // m) * m


def _vmem_capacity_bytes():
    """Physical VMEM per TensorCore; conservative fallback if the query fails."""
    try:
        return int(pltpu.get_tpu_info().vmem_capacity_bytes)
    except Exception:
        return 64 << 20


def _multi_proxy_kernel(cond_ref, adjs_ref, w_ref, x_ref, z_ref, *,
                        tb, n_proxies, sublane):
    """One batch tile.

    cond_ref : (Bp,) int32 in SMEM (scalar-prefetched)  -- which proxy net per row.
    adjs_ref : (tb, 1) int32 in VMEM                    -- proxy index within the net.
    w_ref    : (num_nets * n_proxies, dim) resident VMEM table stack (single buffer).
    x_ref    : (tb, dim)               output tile.
    z_ref    : (tb, n_proxies, dim)    output tile.
    """
    base = pl.program_id(0) * tb

    # --- Z tile: one aligned (n_proxies, dim) VMEM->VMEM copy per batch row. ---
    def body(t, carry):
        c = cond_ref[base + t]
        src0 = pl.multiple_of(c * n_proxies, sublane)   # n_proxies is a sublane multiple
        z_ref[t, :, :] = w_ref[pl.ds(src0, n_proxies), :]
        return carry

    lax.fori_loop(0, tb, body, 0, unroll=8)

    # --- x tile: exact one-hot select of row adjs[t] from the just-written Z
    # tile, reduced on the VPU/XLU, then ONE dense (tb, dim) store. ---
    zt = z_ref[...]                                                  # (tb, np, dim)
    prox_ids = lax.broadcasted_iota(jnp.int32, (tb, n_proxies, 1), 1)
    sel = (prox_ids == adjs_ref[...].reshape(tb, 1, 1)).astype(zt.dtype)
    x_ref[...] = jnp.sum(zt * sel, axis=1).astype(x_ref.dtype)


def multi_proxy_forward(W, cond, adjs, *, tb=64):
    """W: [num_nets, n_proxies, dim]; cond, adjs: [B] int.

    Returns (x: [B, dim], Z: [B, n_proxies, dim])."""
    num_nets, n_proxies, dim = W.shape
    B = int(cond.shape[0])
    itemsize = jnp.dtype(W.dtype).itemsize

    # Packed sublane count: 8 (f32) / 16 (bf16) / 32 (int8). n_proxies and tb
    # are padded/rounded to it so dynamic slice starts are tile-aligned and all
    # output blocks meet the packed min-tile (dense, unmasked stores).
    sublane = max(8, 32 // itemsize)
    n_proxies_p = _round_up(n_proxies, sublane)
    R = num_nets * n_proxies_p

    # Flat row view of the (zero-padded) table stack: row(c, p) = c*n_proxies_p + p.
    if n_proxies_p != n_proxies:
        W_p = jnp.zeros((num_nets, n_proxies_p, dim), W.dtype).at[:, :n_proxies, :].set(W)
    else:
        W_p = W
    Wf = W_p.reshape(R, dim)

    # --- batch tile size: large to amortize per-step overhead and reach HBM
    # write bandwidth, but bounded by the batch and by the VMEM budget. ---
    tb = _round_up(max(int(tb), sublane), sublane)
    tb = min(tb, _round_up(B, sublane))          # don't pad far past the batch

    cap = _vmem_capacity_bytes()
    cap_limit = (cap // 8) * 7                   # headroom for compiler scratch/sems
    headroom = 2 << 20
    w_bytes = R * dim * itemsize                 # single-buffered (pl.Buffered(1))
    # double-buffered Z + x tiles, select intermediates slack, padded idx tile
    per_row = (3 * n_proxies_p + 2) * dim * itemsize + 2 * 128 * 4
    budget = cap_limit - headroom - w_bytes
    if budget < per_row * sublane:
        # TODO(synk): switch to the non-resident (data-dependent index_map /
        # HBM->HBM DMA) variant for proxy stacks that don't fit VMEM.
        raise NotImplementedError("proxy table too large to keep resident in VMEM")
    tb = min(tb, max(sublane, (budget // per_row) // sublane * sublane))
    tb = int(tb)

    n_tiles = int(pl.cdiv(B, tb))
    Bp = n_tiles * tb

    # Clamp indices into range (PyTorch would raise; we document the divergence).
    cond_i = jnp.clip(cond.astype(jnp.int32), 0, num_nets - 1)
    adjs_i = jnp.clip(adjs.astype(jnp.int32), 0, n_proxies - 1)
    cond_sm = jnp.zeros((Bp,), jnp.int32).at[:B].set(cond_i)          # SMEM prefetch
    adjs_vm = jnp.zeros((Bp, 1), jnp.int32).at[:B, 0].set(adjs_i)     # VMEM tile input

    vmem_limit = int(min(max(w_bytes + per_row * tb + headroom, 8 << 20), cap_limit))

    grid_spec = pltpu.PrefetchScalarGridSpec(
        num_scalar_prefetch=1,                   # cond lands in SMEM before the grid
        grid=(n_tiles,),
        in_specs=[
            # Per-tile proxy indices (small VMEM tile per step).
            pl.BlockSpec((tb, 1), lambda i, cond_r: (i, 0)),
            # Full table stack: constant block index + single buffer -> resident,
            # DMA'd from HBM once and reused by every grid step.
            pl.BlockSpec((R, dim), lambda i, cond_r: (0, 0),
                         pipeline_mode=pl.Buffered(1)),
        ],
        out_specs=[
            pl.BlockSpec((tb, dim), lambda i, cond_r: (i, 0)),
            pl.BlockSpec((tb, n_proxies_p, dim), lambda i, cond_r: (i, 0, 0)),
        ],
    )

    kernel = functools.partial(_multi_proxy_kernel, tb=tb,
                               n_proxies=n_proxies_p, sublane=sublane)

    x_p, z_p = pl.pallas_call(
        kernel,
        grid_spec=grid_spec,
        out_shape=(
            jax.ShapeDtypeStruct((Bp, dim), W.dtype),
            jax.ShapeDtypeStruct((Bp, n_proxies_p, dim), W.dtype),
        ),
        compiler_params=pltpu.CompilerParams(
            dimension_semantics=("parallel",),   # independent tiles; shards across TCs on v7x
            vmem_limit_bytes=vmem_limit,
        ),
    )(cond_sm, adjs_vm, Wf)

    return x_p[:B], z_p[:B, :n_proxies, :]


def multi_proxy_forward_single(W, cond):
    """Equivalent of MultiProxyNet.forward_single: just that net's proxy table."""
    return W[cond]   # pure glue; no kernel needed


if __name__ == "__main__":
    key = jax.random.PRNGKey(0)

    # Small deterministic synthetic "checkpoint": 3 proxy nets, 8 proxies each,
    # embedding dim 128 (lane-aligned).
    num_nets, n_proxies, dim = 3, 8, 128
    k_w, k_c, k_a = jax.random.split(key, 3)
    W = jax.random.normal(k_w, (num_nets, n_proxies, dim), dtype=jnp.float32)

    # --- case 1: tiny batch (single small tile) ---
    cond = jnp.array([0, 2, 1, 0], dtype=jnp.int32)
    adjs = jnp.array([3, 5, 0, 7], dtype=jnp.int32)
    x, Z = multi_proxy_forward(W, cond, adjs)
    jax.block_until_ready((x, Z))
    assert x.shape == (cond.shape[0], dim)
    assert Z.shape == (cond.shape[0], n_proxies, dim)
    assert jnp.array_equal(x, W[cond, adjs, :])
    assert jnp.array_equal(Z, W[cond])

    # --- case 2: multi-tile batch with padding (B=77, tb=64 -> 2 grid steps) ---
    B2 = 77
    cond2 = jax.random.randint(k_c, (B2,), 0, num_nets, dtype=jnp.int32)
    adjs2 = jax.random.randint(k_a, (B2,), 0, n_proxies, dtype=jnp.int32)
    x2, Z2 = multi_proxy_forward(W, cond2, adjs2, tb=64)
    jax.block_until_ready((x2, Z2))
    assert jnp.array_equal(x2, W[cond2, adjs2, :])
    assert jnp.array_equal(Z2, W[cond2])

    # --- case 3: bf16 table (packed sublane path; n_proxies padded 8 -> 16) ---
    Wb = W.astype(jnp.bfloat16)
    x3, Z3 = multi_proxy_forward(Wb, cond2, adjs2)
    jax.block_until_ready((x3, Z3))
    assert jnp.array_equal(x3, Wb[cond2, adjs2, :])
    assert jnp.array_equal(Z3, Wb[cond2])

    # forward_single glue check
    assert jnp.array_equal(multi_proxy_forward_single(W, 1), W[1])

    print("KERNEL_OK")
</pallas_src>

<mosaic_0001>
module attributes {stable_mosaic.version = 11 : i64} {
  func.func @_multi_proxy_kernel(%arg0: i32, %arg1: memref<8xi32, #tpu.memory_space<smem>>, %arg2: memref<8x1xi32, #tpu.memory_space<vmem>>, %arg3: memref<24x128xf32, #tpu.memory_space<vmem>>, %arg4: memref<8x128xf32, #tpu.memory_space<vmem>>, %arg5: memref<8x8x128xf32, #tpu.memory_space<vmem>>) attributes {dimension_semantics = [#tpu.dimension_semantics<parallel>], iteration_bounds = array<i64: 1>, scalar_prefetch = 1 : i64, scratch_operands = 0 : i64, tpu.core_type = #tpu.core_type<tc>, window_params = [{transform_indices = @transform_0, window_bounds = array<i64: 8, 1>}, {pipeline_mode = #tpu.pipeline_mode<synchronous>, transform_indices = @transform_1, window_bounds = array<i64: 24, 128>}, {transform_indices = @transform_2, window_bounds = array<i64: 8, 128>}, {transform_indices = @transform_3, window_bounds = array<i64: 8, 8, 128>}]} {
    %c8_i32 = arith.constant 8 : i32
    %0 = arith.muli %arg0, %c8_i32 : i32
    %c0_i32 = arith.constant 0 : i32
    %1 = arith.addi %0, %c0_i32 : i32
    %2 = arith.index_cast %1 : i32 to index
    %3 = memref.load %arg1[%2] : memref<8xi32, #tpu.memory_space<smem>>
    %c8_i32_0 = arith.constant 8 : i32
    %4 = arith.muli %3, %c8_i32_0 : i32
    %5 = tpu.assume_multiple %4, 8 : i32
    %6 = arith.index_cast %5 : i32 to index
    %c0 = arith.constant 0 : index
    %7 = vector.load %arg3[%6, %c0] : memref<24x128xf32, #tpu.memory_space<vmem>>, vector<8x128xf32>
    %8 = arith.index_cast %c0_i32 : i32 to index
    %c0_1 = arith.constant 0 : index
    %c0_2 = arith.constant 0 : index
    %9 = vector.load %arg5[%8, %c0_1, %c0_2] : memref<8x8x128xf32, #tpu.memory_space<vmem>>, vector<1x8x128xf32>
    %10 = vector.shape_cast %9 : vector<1x8x128xf32> to vector<8x128xf32>
    %11 = vector.shape_cast %7 : vector<8x128xf32> to vector<1x8x128xf32>
    tpu.vector_store %arg5[%8, %c0_1, %c0_2], %11 {strides = array<i32>} : memref<8x8x128xf32, #tpu.memory_space<vmem>>, vector<1x8x128xf32>,
    %c1_i32 = arith.constant 1 : i32
    %12 = arith.addi %0, %c1_i32 : i32
    %13 = arith.index_cast %12 : i32 to index
    %14 = memref.load %arg1[%13] : memref<8xi32, #tpu.memory_space<smem>>
    %c8_i32_3 = arith.constant 8 : i32
    %15 = arith.muli %14, %c8_i32_3 : i32
    %16 = tpu.assume_multiple %15, 8 : i32
    %17 = arith.index_cast %16 : i32 to index
    %c0_4 = arith.constant 0 : index
    %18 = vector.load %arg3[%17, %c0_4] : memref<24x128xf32, #tpu.memory_space<vmem>>, vector<8x128xf32>
    %19 = arith.index_cast %c1_i32 : i32 to index
    %c0_5 = arith.constant 0 : index
    %c0_6 = arith.constant 0 : index
    %20 = vector.load %arg5[%19, %c0_5, %c0_6] : memref<8x8x128xf32, #tpu.memory_space<vmem>>, vector<1x8x128xf32>
    %21 = vector.shape_cast %20 : vector<1x8x128xf32> to vector<8x128xf32>
    %22 = vector.shape_cast %18 : vector<8x128xf32> to vector<1x8x128xf32>
    tpu.vector_store %arg5[%19, %c0_5, %c0_6], %22 {strides = array<i32>} : memref<8x8x128xf32, #tpu.memory_space<vmem>>, vector<1x8x128xf32>,
    %c2_i32 = arith.constant 2 : i32
    %23 = arith.addi %0, %c2_i32 : i32
    %24 = arith.index_cast %23 : i32 to index
    %25 = memref.load %arg1[%24] : memref<8xi32, #tpu.memory_space<smem>>
    %c8_i32_7 = arith.constant 8 : i32
    %26 = arith.muli %25, %c8_i32_7 : i32
    %27 = tpu.assume_multiple %26, 8 : i32
    %28 = arith.index_cast %27 : i32 to index
    %c0_8 = arith.constant 0 : index
    %29 = vector.load %arg3[%28, %c0_8] : memref<24x128xf32, #tpu.memory_space<vmem>>, vector<8x128xf32>
    %30 = arith.index_cast %c2_i32 : i32 to index
    %c0_9 = arith.constant 0 : index
    %c0_10 = arith.constant 0 : index
    %31 = vector.load %arg5[%30, %c0_9, %c0_10] : memref<8x8x128xf32, #tpu.memory_space<vmem>>, vector<1x8x128xf32>
    %32 = vector.shape_cast %31 : vector<1x8x128xf32> to vector<8x128xf32>
    %33 = vector.shape_cast %29 : vector<8x128xf32> to vector<1x8x128xf32>
    tpu.vector_store %arg5[%30, %c0_9, %c0_10], %33 {strides = array<i32>} : memref<8x8x128xf32, #tpu.memory_space<vmem>>, vector<1x8x128xf32>,
    %c3_i32 = arith.constant 3 : i32
    %34 = arith.addi %0, %c3_i32 : i32
    %35 = arith.index_cast %34 : i32 to index
    %36 = memref.load %arg1[%35] : memref<8xi32, #tpu.memory_space<smem>>
    %c8_i32_11 = arith.constant 8 : i32
    %37 = arith.muli %36, %c8_i32_11 : i32
    %38 = tpu.assume_multiple %37, 8 : i32
    %39 = arith.index_cast %38 : i32 to index
    %c0_12 = arith.constant 0 : index
    %40 = vector.load %arg3[%39, %c0_12] : memref<24x128xf32, #tpu.memory_space<vmem>>, vector<8x128xf32>
    %41 = arith.index_cast %c3_i32 : i32 to index
    %c0_13 = arith.constant 0 : index
    %c0_14 = arith.constant 0 : index
    %42 = vector.load %arg5[%41, %c0_13, %c0_14] : memref<8x8x128xf32, #tpu.memory_space<vmem>>, vector<1x8x128xf32>
    %43 = vector.shape_cast %42 : vector<1x8x128xf32> to vector<8x128xf32>
    %44 = vector.shape_cast %40 : vector<8x128xf32> to vector<1x8x128xf32>
    tpu.vector_store %arg5[%41, %c0_13, %c0_14], %44 {strides = array<i32>} : memref<8x8x128xf32, #tpu.memory_space<vmem>>, vector<1x8x128xf32>,
    %c4_i32 = arith.constant 4 : i32
    %45 = arith.addi %0, %c4_i32 : i32
    %46 = arith.index_cast %45 : i32 to index
    %47 = memref.load %arg1[%46] : memref<8xi32, #tpu.memory_space<smem>>
    %c8_i32_15 = arith.constant 8 : i32
    %48 = arith.muli %47, %c8_i32_15 : i32
    %49 = tpu.assume_multiple %48, 8 : i32
    %50 = arith.index_cast %49 : i32 to index
    %c0_16 = arith.constant 0 : index
    %51 = vector.load %arg3[%50, %c0_16] : memref<24x128xf32, #tpu.memory_space<vmem>>, vector<8x128xf32>
    %52 = arith.index_cast %c4_i32 : i32 to index
    %c0_17 = arith.constant 0 : index
    %c0_18 = arith.constant 0 : index
    %53 = vector.load %arg5[%52, %c0_17, %c0_18] : memref<8x8x128xf32, #tpu.memory_space<vmem>>, vector<1x8x128xf32>
    %54 = vector.shape_cast %53 : vector<1x8x128xf32> to vector<8x128xf32>
    %55 = vector.shape_cast %51 : vector<8x128xf32> to vector<1x8x128xf32>
    tpu.vector_store %arg5[%52, %c0_17, %c0_18], %55 {strides = array<i32>} : memref<8x8x128xf32, #tpu.memory_space<vmem>>, vector<1x8x128xf32>,
    %c5_i32 = arith.constant 5 : i32
    %56 = arith.addi %0, %c5_i32 : i32
    %57 = arith.index_cast %56 : i32 to index
    %58 = memref.load %arg1[%57] : memref<8xi32, #tpu.memory_space<smem>>
    %c8_i32_19 = arith.constant 8 : i32
    %59 = arith.muli %58, %c8_i32_19 : i32
    %60 = tpu.assume_multiple %59, 8 : i32
    %61 = arith.index_cast %60 : i32 to index
    %c0_20 = arith.constant 0 : index
    %62 = vector.load %arg3[%61, %c0_20] : memref<24x128xf32, #tpu.memory_space<vmem>>, vector<8x128xf32>
    %63 = arith.index_cast %c5_i32 : i32 to index
    %c0_21 = arith.constant 0 : index
    %c0_22 = arith.constant 0 : index
    %64 = vector.load %arg5[%63, %c0_21, %c0_22] : memref<8x8x128xf32, #tpu.memory_space<vmem>>, vector<1x8x128xf32>
    %65 = vector.shape_cast %64 : vector<1x8x128xf32> to vector<8x128xf32>
    %66 = vector.shape_cast %62 : vector<8x128xf32> to vector<1x8x128xf32>
    tpu.vector_store %arg5[%63, %c0_21, %c0_22], %66 {strides = array<i32>} : memref<8x8x128xf32, #tpu.memory_space<vmem>>, vector<1x8x128xf32>,
    %c6_i32 = arith.constant 6 : i32
    %67 = arith.addi %0, %c6_i32 : i32
    %68 = arith.index_cast %67 : i32 to index
    %69 = memref.load %arg1[%68] : memref<8xi32, #tpu.memory_space<smem>>
    %c8_i32_23 = arith.constant 8 : i32
    %70 = arith.muli %69, %c8_i32_23 : i32
    %71 = tpu.assume_multiple %70, 8 : i32
    %72 = arith.index_cast %71 : i32 to index
    %c0_24 = arith.constant 0 : index
    %73 = vector.load %arg3[%72, %c0_24] : memref<24x128xf32, #tpu.memory_space<vmem>>, vector<8x128xf32>
    %74 = arith.index_cast %c6_i32 : i32 to index
    %c0_25 = arith.constant 0 : index
    %c0_26 = arith.constant 0 : index
    %75 = vector.load %arg5[%74, %c0_25, %c0_26] : memref<8x8x128xf32, #tpu.memory_space<vmem>>, vector<1x8x128xf32>
    %76 = vector.shape_cast %75 : vector<1x8x128xf32> to vector<8x128xf32>
    %77 = vector.shape_cast %73 : vector<8x128xf32> to vector<1x8x128xf32>
    tpu.vector_store %arg5[%74, %c0_25, %c0_26], %77 {strides = array<i32>} : memref<8x8x128xf32, #tpu.memory_space<vmem>>, vector<1x8x128xf32>,
    %c7_i32 = arith.constant 7 : i32
    %78 = arith.addi %0, %c7_i32 : i32
    %79 = arith.index_cast %78 : i32 to index
    %80 = memref.load %arg1[%79] : memref<8xi32, #tpu.memory_space<smem>>
    %c8_i32_27 = arith.constant 8 : i32
    %81 = arith.muli %80, %c8_i32_27 : i32
    %82 = tpu.assume_multiple %81, 8 : i32
    %83 = arith.index_cast %82 : i32 to index
    %c0_28 = arith.constant 0 : index
    %84 = vector.load %arg3[%83, %c0_28] : memref<24x128xf32, #tpu.memory_space<vmem>>, vector<8x128xf32>
    %85 = arith.index_cast %c7_i32 : i32 to index
    %c0_29 = arith.constant 0 : index
    %c0_30 = arith.constant 0 : index
    %86 = vector.load %arg5[%85, %c0_29, %c0_30] : memref<8x8x128xf32, #tpu.memory_space<vmem>>, vector<1x8x128xf32>
    %87 = vector.shape_cast %86 : vector<1x8x128xf32> to vector<8x128xf32>
    %88 = vector.shape_cast %84 : vector<8x128xf32> to vector<1x8x128xf32>
    tpu.vector_store %arg5[%85, %c0_29, %c0_30], %88 {strides = array<i32>} : memref<8x8x128xf32, #tpu.memory_space<vmem>>, vector<1x8x128xf32>,
    %c8_i32_31 = arith.constant 8 : i32
    %c0_32 = arith.constant 0 : index
    %c0_33 = arith.constant 0 : index
    %c0_34 = arith.constant 0 : index
    %89 = vector.load %arg5[%c0_32, %c0_33, %c0_34] : memref<8x8x128xf32, #tpu.memory_space<vmem>>, vector<8x8x128xf32>
    %90 = tpu.iota {dimensions = array<i32: 1>} : vector<8x8x1xi32>
    %c0_35 = arith.constant 0 : index
    %c0_36 = arith.constant 0 : index
    %91 = vector.load %arg2[%c0_35, %c0_36] : memref<8x1xi32, #tpu.memory_space<vmem>>, vector<8x1xi32>
    %92 = vector.shape_cast %91 : vector<8x1xi32> to vector<8x1x1xi32>
    %93 = vector.broadcast %92 : vector<8x1x1xi32> to vector<8x8x1xi32>
    %94 = arith.cmpi eq, %90, %93 : vector<8x8x1xi32>
    %95 = arith.extui %94 : vector<8x8x1xi1> to vector<8x8x1xi32>
    %96 = arith.sitofp %95 : vector<8x8x1xi32> to vector<8x8x1xf32>
    %97 = vector.broadcast %96 : vector<8x8x1xf32> to vector<8x8x128xf32>
    %98 = arith.mulf %89, %97 : vector<8x8x128xf32>
    %cst = arith.constant dense<0.000000e+00> : vector<8x128xf32>
    %99 = vector.multi_reduction <add>, %98, %cst [1] : vector<8x8x128xf32> to vector<8x128xf32>
    %c0_37 = arith.constant 0 : index
    %c0_38 = arith.constant 0 : index
    %100 = vector.load %arg4[%c0_37, %c0_38] : memref<8x128xf32, #tpu.memory_space<vmem>>, vector<8x128xf32>
    tpu.vector_store %arg4[%c0_37, %c0_38], %99 {strides = array<i32>} : memref<8x128xf32, #tpu.memory_space<vmem>>, vector<8x128xf32>,
    return
  }
  func.func @transform_0(%arg0: i32, %arg1: memref<8xi32, #tpu.memory_space<smem>>) -> (i32, i32) {
    %c0_i32 = arith.constant 0 : i32
    %c0_i32_0 = arith.constant 0 : i32
    return %arg0, %c0_i32 : i32, i32
  }
  func.func @transform_1(%arg0: i32, %arg1: memref<8xi32, #tpu.memory_space<smem>>) -> (i32, i32) {
    %c0_i32 = arith.constant 0 : i32
    %c0_i32_0 = arith.constant 0 : i32
    %c0_i32_1 = arith.constant 0 : i32
    return %c0_i32, %c0_i32_0 : i32, i32
  }
  func.func @transform_2(%arg0: i32, %arg1: memref<8xi32, #tpu.memory_space<smem>>) -> (i32, i32) {
    %c0_i32 = arith.constant 0 : i32
    %c0_i32_0 = arith.constant 0 : i32
    return %arg0, %c0_i32 : i32, i32
  }
  func.func @transform_3(%arg0: i32, %arg1: memref<8xi32, #tpu.memory_space<smem>>) -> (i32, i32, i32) {
    %c0_i32 = arith.constant 0 : i32
    %c0_i32_0 = arith.constant 0 : i32
    %c0_i32_1 = arith.constant 0 : i32
    return %arg0, %c0_i32, %c0_i32_0 : i32, i32, i32
  }
}

</mosaic_0001>

<bundles_post_ra>
// kernel: tpu_custom_call.1
= control target key start
LH: loop header
LB: loop body
LE: loop exit
PB: predicated region body
PF: predicated region fallthrough
CT: control target
= control target key end

     0   :  { %s615_s0 = inlined_call_operand.vmem [shape: s32[8], index: 0, kind: input, shape index: {}]   ;;  %s616_s1 = inlined_call_operand.vmem [shape: s32[8,1], index: 1, kind: input, shape index: {}]   ;;  %s617_s2 = inlined_call_operand.hbm [shape: f32[24,128], index: 2, kind: input, shape index: {}]   ;;  %s618_s3 = inlined_call_operand.hbm [shape: f32[8,128], index: 3, kind: output, shape index: {0}]   ;;  %s619_s4 = inlined_call_operand.hbm [shape: f32[8,8,128], index: 4, kind: output, shape index: {1}]  }
   0x1   :  { %s10_s17 = sshll.u32 %s615_s0, 4  ;;  %s11_s17 = int_to_ptr.vmem [resolvable:$true] %s10_s17 }
   0x2   :  { %s429_s18 = scalar_lea.vmem %s11_s17, 16  ;;  %p434_p1 = scmp.lt.s32.totalorder %s11_s17, %s11_s17 }
   0x3   :  { %p430_p0 = scmp.ne.s32.totalorder %s11_s17, %s429_s18  ;;  %p435_p2 = scmp.lt.s32.totalorder %s429_s18, %s429_s18 }
   0x5   :  { %p436_p3 = por %p435_p2, %p434_p1 }
   0x7   :  { %p437_p4 = pnand %p436_p3, %p430_p0 }
   0x9   :  { %440 = shalt.err (!%p437_p4)  }
   0xa   :  { %s515_s19 = smov [#allocation3]  }
   0xb   :  { %13 = dma.vmem_to_smem %s11_s17, 16, %s515_s19, [#allocation2] }
   0xc   :  { %507 = dma.done.wait [#allocation2], 16 }
   0xd   :  { %508 = vsyncadd [#allocation2], 4294967280 }
   0xe   :  { %15 = sfence }
   0xf   :  { %16 = vsyncpa [#allocation5], 0 }
  0x10   :  { %17 = vsyncpa [#allocation6], 0 }
  0x11   :  { %18 = vsyncpa [#allocation9], 0  ;;  %s516_s20 = smov [#allocation4]   ;;  %s441_s23 = scalar_lea.hbm %s617_s2, 384 }
  0x12   :  { %s26_s21 = sshll.u32 %s516_s20, 4  ;;  %p442_p5 = scmp.ne.s32.totalorder %s617_s2, %s441_s23  ;;  %s27_s21 = int_to_ptr.vmem [resolvable:$true] %s26_s21 }
  0x13   :  { %p445_p6 = scmp.lt.u32.totalorder %s441_s23, %s617_s2 }
  0x15   :  { %p447_p7 = pnand %p445_p6, %p442_p5 }
  0x17   :  { %450 = shalt.err (!%p447_p7)
}
  0x18   :  { %s451_s28 = scalar_lea.vmem %s27_s21, 384  ;;  %p456_p9 = scmp.lt.s32.totalorder %s27_s21, %s27_s21 }
  0x19   :  { %p452_p8 = scmp.ne.s32.totalorder %s27_s21, %s451_s28  ;;  %p457_p10 = scmp.lt.s32.totalorder %s451_s28, %s451_s28 }
  0x1b   :  { %p458_p11 = por %p457_p10, %p456_p9 }
  0x1d   :  { %p459_p12 = pnand %p458_p11, %p452_p8 }
  0x1f   :  { %462 = shalt.err (!%p459_p12)
}
  0x20   :  { %s517_s29 = smov 128   ;;  %s518_s30 = smov 8  }
  0x21   :  { %32 = dma.hbm_to_vmem [thread:$0]  %s617_s2, 384, %s27_s21, [#allocation5], %s517_s29, %s517_s29, %s518_s30  }
  0x22   :  { %509 = dma.done.wait [#allocation5], 384  }
  0x23   :  { %510 = vsyncadd [#allocation5], 4294966912  ;;  %v99_v0 = vlaneseq  ;;  %v519_v1 = vmov 0   ;;  %v520_v2 = vmov 1966171168   ;;  %v101_v7 = vld [vmem:[%s616_s1] sm:$0xff] }
  0x24   :  { %406 = vset.pattern.permute.xlu0 %v519_v1  ;;  %v104_v3 = vunpack.c.l.s4 %v520_v2  ;;  %417 = vset.pattern.permute.xlu1 %v519_v1  ;;  %v102_v10 = vcombine.high %v101_v7, %v101_v7  ;;  %s570_s2 = sld [smem:[#allocation3]]  ;;  %s572_s9 = sld [smem:[#allocation3 + $0x1]]  ;;  %v521_v22 = vmov 0.0  }
  0x25   :  { %v100_v4 = vshrl.u32 %v99_v0, 7  ;;  %s574_s1 = sld [smem:[#allocation3 + $0x4]]  ;;  %s576_s10 = sld [smem:[#allocation3 + $0x5]] }
  0x26   :  { %v105_v5 = vunpack.c.0.s8 %v104_v3  ;;  %s578_s11 = sld [smem:[#allocation3 + $0x2]]  ;;  %s580_s12 = sld [smem:[#allocation3 + $0x3]] }
  0x27   :  { %v153_v9 = vsub.s32 0, %v100_v4  ;;  %s385_s21 = sld [smem:[#allocation3 + $0x6]]  ;;  %s387_s0 = sld [smem:[#allocation3 + $0x7]] }
  0x28   :  { %v108_v6 = vsub.s32 %v105_v5, %v100_v4  ;;  %s522_s6 = smov [#allocation8]  }
  0x29   :  { %s342_s7 = sshll.u32 %s522_s6, 4  ;;  %s343_s7 = int_to_ptr.vmem [resolvable:$true] %s342_s7 }
  0x2a   :  { %v109_v8 = vrot.slane %v101_v7, %v108_v6  ;;  %v116_v13 = vrot.slane %v102_v10, %v108_v6  ;;  %s374_s13 = sshll.u32 %s570_s2, 3  ;;  %s376_s14 = sshll.u32 %s572_s9, 3 }
  0x2b   :  { %s39_s15 = scalar_lea.vmem [#allocation4], %s374_s13  ;;  %s45_s16 = scalar_lea.vmem [#allocation4], %s376_s14 }
  0x2c   :  { %v117_v11 = vcombine.high %v109_v8, %v109_v8  ;;  %v125_v12 = vrot.slane %v109_v8, %v108_v6  ;;  %v118_v17 = vcombine.high %v116_v13, %v116_v13  ;;  %v132_v18 = vrot.slane %v116_v13, %v108_v6  ;;  %v40_v41 = vld [vmem:[%s39_s15] sm:$0xff]  ;;  %s382_s17 = sshll.u32 %s574_s1, 3  ;;  %s384_s18 = sshll.u32 %s576_s10, 3 }
  0x2d   :  { %v46_v42 = vld [vmem:[%s45_s16] sm:$0xff]  ;;  %41 = vst [vmem:[#allocation8] sm:$0xff] %v40_v41  ;;  %s66_s19 = scalar_lea.vmem [#allocation4], %s382_s17  ;;  %s73_s20 = scalar_lea.vmem [#allocation4], %s384_s18 }
  0x2e   :  { %v139_v14 = vrot.slane %v117_v11, %v108_v6  ;;  %v147_v15 = vcombine.high %v125_v12, %v125_v12  ;;  %v154_v16 = vrot.slane %v125_v12, %v153_v9  ;;  %v146_v21 = vrot.slane %v118_v17, %v108_v6  ;;  %48 = vst [vmem:[#allocation8 + $0x8] sm:$0xff] %v46_v42  ;;  %v67_v45 = vld [vmem:[%s66_s19] sm:$0xff]  ;;  %s378_s22 = sshll.u32 %s578_s11, 3  ;;  %s380_s23 = sshll.u32 %s580_s12, 3 }
  0x2f   :  { %v148_v24 = vcombine.high %v132_v18, %v132_v18  ;;  %v170_v25 = vrot.slane %v132_v18, %v153_v9  ;;  %v74_v46 = vld [vmem:[%s73_s20] sm:$0xff]  ;;  %69 = vst [vmem:[#allocation8 + $0x20] sm:$0xff] %v67_v45  ;;  %s52_s24 = scalar_lea.vmem [#allocation4], %s378_s22  ;;  %s59_s25 = scalar_lea.vmem [#allocation4], %s380_s23 }
  0x30   :  { %v158_v19 = vrot.slane %v139_v14, %v153_v9  ;;  %vm183_vm0 = vcmp.eq.s32.totalorder %v100_v4, %v154_v16  ;;  %v149_v20 = vcombine.high %v139_v14, %v139_v14  ;;  %v162_v26 = vrot.slane %v147_v15, %v153_v9  ;;  %76 = vst [vmem:[#allocation8 + $0x28] sm:$0xff] %v74_v46  ;;  %v53_v47 = vld [vmem:[%s52_s24] sm:$0xff]  ;;  %s386_s26 = sshll.u32 %s385_s21, 3  ;;  %s388_s27 = sshll.u32 %s387_s0, 3 }
  0x31   :  { %v389_v23 = vsel %vm183_vm0, 1.0, %v521_v22  ;;  %v174_v27 = vrot.slane %v146_v21, %v153_v9  ;;  %v150_v28 = vcombine.high %v146_v21, %v146_v21  ;;  %vm187_vm2 = vcmp.eq.s32.totalorder %v100_v4, %v170_v25  ;;  %v60_v48 = vld [vmem:[%s59_s25] sm:$0xff]  ;;  %55 = vst [vmem:[#allocation8 + $0x10] sm:$0xff] %v53_v47  ;;  %s80_s28 = scalar_lea.vmem [#allocation4], %s386_s26  ;;  %s87_s5 = scalar_lea.vmem [#allocation4], %s388_s27 }
  0x32   :  { %vm184_vm1 = vcmp.eq.s32.totalorder %v100_v4, %v158_v19  ;;  %v166_v29 = vrot.slane %v149_v20, %v153_v9  ;;  %vm185_vm3 = vcmp.eq.s32.totalorder %v100_v4, %v162_v26  ;;  %v178_v31 = vrot.slane %v148_v24, %v153_v9  ;;  %62 = vst [vmem:[#allocation8 + $0x18] sm:$0xff] %v60_v48  ;;  %v81_v49 = vld [vmem:[%s80_s28] sm:$0xff]  ;;  %s463_s8 = scalar_lea.vmem %s343_s7, 1024  ;;  %p468_p0 = scmp.lt.s32.totalorder %s343_s7, %s343_s7 }
  0x33   :  { %v390_v30 = vsel %vm184_vm1, 1.0, %v521_v22  ;;  %vm188_vm4 = vcmp.eq.s32.totalorder %v100_v4, %v174_v27  ;;  %v393_v33 = vsel %vm187_vm2, 1.0, %v521_v22  ;;  %v391_v35 = vsel %vm185_vm3, 1.0, %v521_v22  ;;  %v88_v50 = vld [vmem:[%s87_s5] sm:$0xff]  ;;  %83 = vst [vmem:[#allocation8 + $0x30] sm:$0xff] %v81_v49  ;;  %p464_p13 = scmp.ne.s32.totalorder %s343_s7, %s463_s8  ;;  %p469_p1 = scmp.lt.s32.totalorder %s463_s8, %s463_s8 }
  0x34   :  { %v407_v32 = vpack.i.bf16 %v390_v30, %v389_v23  ;;  %vm186_vm5 = vcmp.eq.s32.totalorder %v100_v4, %v166_v29  ;;  %v394_v34 = vsel %vm188_vm4, 1.0, %v521_v22  ;;  %v182_v37 = vrot.slane %v150_v28, %v153_v9  ;;  %90 = vst [vmem:[#allocation8 + $0x38] sm:$0xff] %v88_v50 }
  0x35   :  { %v392_v36 = vsel %vm186_vm5, 1.0, %v521_v22  ;;  %v418_v38 = vpack.i.bf16 %v394_v34, %v393_v33  ;;  %vm189_vm6 = vcmp.eq.s32.totalorder %v100_v4, %v178_v31  ;;  %p470_p2 = por %p469_p1, %p468_p0 }
  0x36   :  { %408 = vperm.xlu0 %406, %v407_v32   ;;  %v412_v39 = vpack.i.bf16 %v392_v36, %v391_v35  ;;  %vm190_vm7 = vcmp.eq.s32.totalorder %v100_v4, %v182_v37  ;;  %v395_v40 = vsel %vm189_vm6, 1.0, %v521_v22 }
  0x37   :  { %419 = vperm.xlu1 %417, %v418_v38   ;;  %v396_v43 = vsel %vm190_vm7, 1.0, %v521_v22  ;;  %p471_p3 = pnand %p470_p2, %p464_p13 }
  0x38   :  { %v423_v44 = vpack.i.bf16 %v396_v43, %v395_v40 }
  0x3a   :  { %413 = vperm.xlu0 %406, %v412_v39  }
  0x3b   :  { %424 = vperm.xlu1 %417, %v423_v44  }
  0x3c   :  { %474 = shalt.err (!%p471_p3)
}
  0x3d   :  { %s475_s1 = scalar_lea.hbm %s619_s4, 1024 }
  0x3e   :  { %p476_p4 = scmp.ne.s32.totalorder %s619_s4, %s475_s1  ;;  %p479_p5 = scmp.lt.u32.totalorder %s475_s1, %s619_s4 }
  0x40   :  { %p481_p6 = pnand %p479_p5, %p476_p4 }
  0x42   :  { %484 = shalt.err (!%p481_p6)
}
  0x43   :  { %348 = dma.vmem_to_hbm [thread:$0]  %s343_s7, 1024, %s619_s4, [#allocation9], %s517_s29, %s517_s29, %s518_s30   ;;  %vm311_vm8 = vcmask 1041409   ;;  %vm313_vm9 = vcmask 1042434   ;;  %vm315_vm10 = vcmask 1043459   ;;  %vm317_vm11 = vcmask 1044484  }
  0x44   :  { %vm319_vm12 = vcmask 1045509   ;;  %vm321_vm13 = vcmask 1046534   ;;  %s523_s4 = smov [#allocation7]   ;;  %vm323_vm14 = vcmask 1047559  }
  0x45   :  { %s333_s29 = sshll.u32 %s523_s4, 4  ;;  %s334_s29 = int_to_ptr.vmem [resolvable:$true] %s333_s29 }
  0x46   :  { %s485_s30 = scalar_lea.vmem %s334_s29, 128  ;;  %p490_p8 = scmp.lt.s32.totalorder %s334_s29, %s334_s29 }
  0x47   :  { %p486_p7 = scmp.ne.s32.totalorder %s334_s29, %s485_s30  ;;  %p491_p9 = scmp.lt.s32.totalorder %s485_s30, %s485_s30 }
  0x49   :  { %p492_p10 = por %p491_p9, %p490_p8 }
  0x4b   :  { %p493_p11 = pnand %p492_p10, %p486_p7 }
  0xb5   :  { %v409_v51 = vpop.permute.xlu0 %408 }
  0xb6   :  { %v411_v52 = vunpack.i.h.bf16 %v409_v51  ;;  %v410_v53 = vunpack.i.l.bf16 %v409_v51  ;;  %v420_v54 = vpop.permute.xlu1 %419 }
  0xb7   :  { %v422_v57 = vunpack.i.h.bf16 %v420_v54  ;;  %v421_v58 = vunpack.i.l.bf16 %v420_v54 }
  0xb8   :  { %v247_v55 = vmul.f32 %v410_v53, %v40_v41  ;;  %v248_v56 = vmul.f32 %v411_v52, %v46_v42 }
  0xb9   :  { %v414_v59 = vpop.permute.xlu0 %413  ;;  %v251_v62 = vmul.f32 %v421_v58, %v67_v45  ;;  %v252_v63 = vmul.f32 %v422_v57, %v74_v46 }
  0xba   :  { %v255_v60 = vrot.slane %v247_v55, 4  ;;  %v261_v61 = vrot.slane %v248_v56, 4  ;;  %v416_v0 = vunpack.i.h.bf16 %v414_v59  ;;  %v415_v1 = vunpack.i.l.bf16 %v414_v59  ;;  %v425_v2 = vpop.permute.xlu1 %424 }
  0xbb   :  { %v279_v5 = vrot.slane %v251_v62, 4  ;;  %v285_v6 = vrot.slane %v252_v63, 4  ;;  %v427_v9 = vunpack.i.h.bf16 %v425_v2  ;;  %v426_v10 = vunpack.i.l.bf16 %v425_v2 }
  0xbc   :  { %v256_v3 = vadd.f32 %v255_v60, %v247_v55  ;;  %v262_v4 = vadd.f32 %v261_v61, %v248_v56  ;;  %v249_v7 = vmul.f32 %v415_v1, %v53_v47  ;;  %v250_v8 = vmul.f32 %v416_v0, %v60_v48 }
  0xbd   :  { %v280_v13 = vadd.f32 %v279_v5, %v251_v62  ;;  %v286_v14 = vadd.f32 %v285_v6, %v252_v63  ;;  %v253_v17 = vmul.f32 %v426_v10, %v81_v49  ;;  %v254_v18 = vmul.f32 %v427_v9, %v88_v50 }
  0xbe   :  { %v257_v11 = vrot.slane %v256_v3, 2  ;;  %v263_v12 = vrot.slane %v262_v4, 2  ;;  %v267_v15 = vrot.slane %v249_v7, 4  ;;  %v273_v16 = vrot.slane %v250_v8, 4 }
  0xbf   :  { %v281_v21 = vrot.slane %v280_v13, 2  ;;  %v287_v22 = vrot.slane %v286_v14, 2  ;;  %v291_v25 = vrot.slane %v253_v17, 4  ;;  %v297_v26 = vrot.slane %v254_v18, 4 }
  0xc0   :  { %v258_v19 = vadd.f32 %v257_v11, %v256_v3  ;;  %v264_v20 = vadd.f32 %v263_v12, %v262_v4  ;;  %v268_v23 = vadd.f32 %v267_v15, %v249_v7  ;;  %v274_v24 = vadd.f32 %v273_v16, %v250_v8 }
  0xc1   :  { %v282_v29 = vadd.f32 %v281_v21, %v280_v13  ;;  %v292_v32 = vadd.f32 %v291_v25, %v253_v17  ;;  %v298_v33 = vadd.f32 %v297_v26, %v254_v18  ;;  %v288_v34 = vadd.f32 %v287_v22, %v286_v14 }
  0xc2   :  { %v259_v27 = vrot.slane %v258_v19, 1  ;;  %v265_v28 = vrot.slane %v264_v20, 1  ;;  %v269_v30 = vrot.slane %v268_v23, 2  ;;  %v275_v31 = vrot.slane %v274_v24, 2 }
  0xc3   :  { %v293_v37 = vrot.slane %v292_v32, 2  ;;  %v299_v38 = vrot.slane %v298_v33, 2  ;;  %v283_v41 = vrot.slane %v282_v29, 1  ;;  %v289_v46 = vrot.slane %v288_v34, 1 }
  0xc4   :  { %v270_v35 = vadd.f32 %v269_v30, %v268_v23  ;;  %v276_v36 = vadd.f32 %v275_v31, %v274_v24  ;;  %v260_v39 = vadd.f32 %v259_v27, %v258_v19  ;;  %v266_v40 = vadd.f32 %v265_v28, %v264_v20 }
  0xc5   :  { %v294_v44 = vadd.f32 %v293_v37, %v292_v32  ;;  %v300_v45 = vadd.f32 %v299_v38, %v298_v33  ;;  %v284_v52 = vadd.f32 %v283_v41, %v282_v29  ;;  %v290_v54 = vadd.f32 %v289_v46, %v288_v34 }
  0xc6   :  { %v271_v42 = vrot.slane %v270_v35, 1  ;;  %v277_v43 = vrot.slane %v276_v36, 1  ;;  %v312_v50 = vsel %vm311_vm8, %v266_v40, %v260_v39 }
  0xc7   :  { %v295_v49 = vrot.slane %v294_v44, 1  ;;  %v301_v51 = vrot.slane %v300_v45, 1 }
  0xc8   :  { %v272_v47 = vadd.f32 %v271_v42, %v270_v35  ;;  %v278_v48 = vadd.f32 %v277_v43, %v276_v36 }
  0xc9   :  { %v296_v56 = vadd.f32 %v295_v49, %v294_v44  ;;  %v302_v58 = vadd.f32 %v301_v51, %v300_v45 }
  0xca   :  { %v314_v53 = vsel %vm313_vm9, %v272_v47, %v312_v50 }
  0xcb   :  { %v316_v55 = vsel %vm315_vm10, %v278_v48, %v314_v53 }
  0xcc   :  { %v318_v57 = vsel %vm317_vm11, %v284_v52, %v316_v55 }
  0xcd   :  { %v320_v59 = vsel %vm319_vm12, %v290_v54, %v318_v57 }
  0xce   :  { %v322_v60 = vsel %vm321_vm13, %v296_v56, %v320_v59 }
  0xcf   :  { %v324_v61 = vsel %vm323_vm14, %v302_v58, %v322_v60 }
  0xd0   :  { %326 = vst [vmem:[#allocation7] sm:$0xff] %v324_v61 }
  0xd1   :  { %496 = shalt.err (!%p493_p11)
}
  0xd2   :  { %s497_s18 = scalar_lea.hbm %s618_s3, 128 }
  0xd3   :  { %p498_p12 = scmp.ne.s32.totalorder %s618_s3, %s497_s18  ;;  %p501_p13 = scmp.lt.u32.totalorder %s497_s18, %s618_s3 }
  0xd5   :  { %p503_p0 = pnand %p501_p13, %p498_p12 }
  0xd7   :  { %506 = shalt.err (!%p503_p0)
}
  0xd8   :  { %336 = dma.vmem_to_hbm [thread:$0]  %s334_s29, 128, %s618_s3, [#allocation6]  }
  0xd9   :  { %511 = dma.done.wait [#allocation6], 128  }
  0xda   :  { %512 = vsyncadd [#allocation6], 4294967168 }
  0xdb   :  { %513 = dma.done.wait [#allocation9], 1024  }
  0xdc   :  { %514 = vsyncadd [#allocation9], 4294966272 }
  0xdd   :  { %355 = vsyncpa [#allocation5], 1 }
  0xde   :  { %356 = vsyncpa [#allocation6], 1 }
  0xdf   :  { %357 = vsyncpa [#allocation9], 1 }

</bundles_post_ra>
